<compile_context>
chip_gen: v5e
topology: v5e:2x2
jax: 0.10.0
libtpu: 0.0.40
codegen_flags: <defaults>
</compile_context>

<pallas_src>
import functools

import jax
import jax.numpy as jnp
from jax.experimental import pallas as pl
from jax.experimental.pallas import tpu as pltpu

LN_EPS = 1e-5


def _round_up(x, m):
    return ((x + m - 1) // m) * m


def _detect_vmem_bytes():
    """Physical per-core VMEM via a trace-time query; conservative v7x fallback."""
    try:
        info = pltpu.get_tpu_info()
        v = getattr(info, "vmem_capacity_bytes", None)
        if v:
            return int(v)
    except Exception:
        pass
    return 64 * 1024 * 1024


_PHYS_VMEM = _detect_vmem_bytes()
if _PHYS_VMEM >= 100 * 1024 * 1024:        # v5e / v6e: 128 MiB per TensorCore
    _VMEM_LIMIT_BYTES = 112 * 1024 * 1024  # must be raised well above the scoped default
    _VMEM_BUDGET_BYTES = 96 * 1024 * 1024
    _TN_MAX_DEFAULT = 2048
else:                                      # v7x: 64 MiB per TensorCore
    _VMEM_LIMIT_BYTES = 56 * 1024 * 1024   # headroom below physical for Mosaic scratch
    _VMEM_BUDGET_BYTES = 40 * 1024 * 1024
    _TN_MAX_DEFAULT = 1024


# ---------------------------------------------------------------------------
# Kernel bodies
# ---------------------------------------------------------------------------
def _one_layer(x, w1, b1, w2, b2, gamma, beta, inv_d):
    """One MLP-only encoder layer on an f32 (tn, Dp) tile.

    bf16 into the MXU with f32 accumulation; residual + LayerNorm in f32.
    """
    h = jnp.dot(x.astype(jnp.bfloat16), w1, preferred_element_type=jnp.float32) + b1
    h = jnp.maximum(h, 0.0)
    ff = jnp.dot(h.astype(jnp.bfloat16), w2, preferred_element_type=jnp.float32) + b2
    y = x + ff
    # Padded columns of y are exactly zero (zero-padded x / W2 / b2), so summing over
    # Dp and dividing by the real D gives the correct stats without a column mask;
    # var = E[y^2] - mu^2 avoids an extra (tn, Dp) VPU multiply per layer.
    mu = jnp.sum(y, axis=-1, keepdims=True) * inv_d
    var = jnp.sum(y * y, axis=-1, keepdims=True) * inv_d - mu * mu
    # Padded output columns stay zero because gamma/beta are zero-padded.
    return (y - mu) * jax.lax.rsqrt(var + LN_EPS) * gamma + beta


def _fused_kernel(x_ref, w1_ref, b1_ref, w2_ref, side_ref, o_ref, *, n_layers, d_real):
    """Resident path: all layers applied to one (tn, Dp) tile, weights stay in VMEM."""
    x = x_ref[...].astype(jnp.float32)
    inv_d = 1.0 / d_real
    for l in range(n_layers):                     # static unroll (num_layers is small)
        side = side_ref[l]                        # (3, Dp) f32: b2 / gamma / beta
        x = _one_layer(x, w1_ref[l], b1_ref[l], w2_ref[l],
                       side[0:1, :], side[1:2, :], side[2:3, :], inv_d)
    o_ref[...] = x.astype(o_ref.dtype)


def _stream_kernel(x_ref, w1_ref, b1_ref, w2_ref, side_ref, o_ref, x_sc, *, n_layers, d_real):
    """Streaming path: one layer per grid step; the x tile is carried in VMEM scratch."""
    l = pl.program_id(1)

    @pl.when(l == 0)
    def _():
        x_sc[...] = x_ref[...].astype(jnp.float32)

    side = side_ref[0]                            # (3, Dp) f32
    x = _one_layer(x_sc[...], w1_ref[0], b1_ref[0], w2_ref[0],
                   side[0:1, :], side[1:2, :], side[2:3, :], 1.0 / d_real)
    x_sc[...] = x

    @pl.when(l == n_layers - 1)
    def _():
        o_ref[...] = x.astype(o_ref.dtype)


# ---------------------------------------------------------------------------
# Planning (VMEM budgeting / tile selection)
# ---------------------------------------------------------------------------
def _layer_w_bytes(dp, hp):
    # one layer: bf16 W1/W2 + f32 b1 + f32 [b2; gamma; beta]
    return 2 * dp * hp * 2 + 4 * hp + 4 * 3 * dp


def _act_bytes(tn, dp, hp):
    # double-buffered f32 in/out x tiles + live f32 x/y/ff/h + bf16 MXU copies
    return 16 * tn * dp + 4 * (3 * tn * dp + tn * hp) + 2 * tn * (dp + hp)


def _plan(n, dp, hp, n_layers, tn_max, force_streaming):
    """Pick the row tile tn and whether to stream weights layer-by-layer."""
    n8 = _round_up(max(n, 1), 8)
    # Default BlockSpec pipelining allocates 2 buffers per input even with a constant
    # index_map, so the resident weight stack must be counted twice.
    w_res = 2 * n_layers * _layer_w_bytes(dp, hp)
    w_stream = 2 * _layer_w_bytes(dp, hp)

    streaming = bool(force_streaming) or (w_res + _act_bytes(8, dp, hp) > _VMEM_BUDGET_BYTES)
    w_bytes = w_stream if streaming else w_res

    tn = max(8, (min(tn_max, n8) // 8) * 8)
    # Megacore: keep >= 2 grid steps on the "parallel" N axis when there is enough
    # work, so v7x's two TensorCores both get a share.
    if n8 >= 256:
        tn = min(tn, _round_up((n8 + 1) // 2, 8))
    while tn > 8:
        extra = tn * dp * 4 if streaming else 0   # carried-x VMEM scratch
        if w_bytes + _act_bytes(tn, dp, hp) + extra <= _VMEM_BUDGET_BYTES:
            break
        tn = max(8, ((tn // 2) // 8) * 8)
    return tn, streaming


# ---------------------------------------------------------------------------
# Parameter preparation / wrapper
# ---------------------------------------------------------------------------
def prepare_params(layer_params):
    """Stack per-layer params, zero-pad D/H up to multiples of 128, bf16 weights."""
    d, h = layer_params[0]["w1"].shape
    dp, hp = _round_up(d, 128), _round_up(h, 128)

    def pad2(a, r, c):
        return jnp.pad(a, ((0, r - a.shape[0]), (0, c - a.shape[1])))

    # bf16 weights for the MXU (f32 accumulation in-kernel); biases / LN params in f32.
    w1 = jnp.stack([pad2(p["w1"], dp, hp) for p in layer_params]).astype(jnp.bfloat16)
    w2 = jnp.stack([pad2(p["w2"], hp, dp) for p in layer_params]).astype(jnp.bfloat16)
    b1 = jnp.stack([pad2(p["b1"], 1, hp) for p in layer_params]).astype(jnp.float32)
    side = jnp.stack([                                              # (L, 3, Dp)
        jnp.concatenate([pad2(p["b2"], 1, dp),
                         pad2(p["gamma"], 1, dp),
                         pad2(p["beta"], 1, dp)], axis=0)
        for p in layer_params
    ]).astype(jnp.float32)
    return {"w1": w1, "b1": b1, "w2": w2, "side": side}


@functools.partial(jax.jit, static_argnames=("tn_max", "force_streaming"))
def omics_encoder_forward(omics_representation, prepared, *, tn_max=None, force_streaming=False):
    """OmicsEncoder.forward (eval mode) for inputs {'omics_representation': x}."""
    x = omics_representation
    if x.ndim == 2:                               # matches `in_main.unsqueeze(1)`
        x = x[:, None, :]
    b, s, d = x.shape
    n = b * s
    x2d = x.reshape(n, d)

    n_layers, dp, hp = prepared["w1"].shape
    if tn_max is None:
        tn_max = _TN_MAX_DEFAULT
    tn, streaming = _plan(n, dp, hp, n_layers, tn_max, force_streaming)
    n_pad = _round_up(n, tn)
    x_pad = jnp.pad(x2d, ((0, n_pad - n), (0, dp - d)))       # zero-pad rows + lanes

    args = (x_pad, prepared["w1"], prepared["b1"], prepared["w2"], prepared["side"])

    if streaming:
        kernel = functools.partial(_stream_kernel, n_layers=n_layers, d_real=d)
        out = pl.pallas_call(
            kernel,
            out_shape=jax.ShapeDtypeStruct((n_pad, dp), x2d.dtype),
            grid_spec=pltpu.PrefetchScalarGridSpec(
                num_scalar_prefetch=0,
                grid=(n_pad // tn, n_layers),
                in_specs=[
                    pl.BlockSpec((tn, dp), lambda i, l: (i, 0)),        # x tile
                    pl.BlockSpec((1, dp, hp), lambda i, l: (l, 0, 0)),  # W1[l]
                    pl.BlockSpec((1, 1, hp), lambda i, l: (l, 0, 0)),   # b1[l]
                    pl.BlockSpec((1, hp, dp), lambda i, l: (l, 0, 0)),  # W2[l]
                    pl.BlockSpec((1, 3, dp), lambda i, l: (l, 0, 0)),   # [b2;gamma;beta][l]
                ],
                out_specs=pl.BlockSpec((tn, dp), lambda i, l: (i, 0)),
                scratch_shapes=[pltpu.VMEM((tn, dp), jnp.float32)],     # carried x tile
            ),
            compiler_params=pltpu.CompilerParams(
                dimension_semantics=("parallel", "arbitrary"),
                vmem_limit_bytes=_VMEM_LIMIT_BYTES,
            ),
        )(*args)
    else:
        kernel = functools.partial(_fused_kernel, n_layers=n_layers, d_real=d)
        const3 = lambda i: (0, 0, 0)
        out = pl.pallas_call(
            kernel,
            out_shape=jax.ShapeDtypeStruct((n_pad, dp), x2d.dtype),
            grid_spec=pltpu.PrefetchScalarGridSpec(
                num_scalar_prefetch=0,
                grid=(n_pad // tn,),
                in_specs=[
                    pl.BlockSpec((tn, dp), lambda i: (i, 0)),           # x tile
                    pl.BlockSpec((n_layers, dp, hp), const3),           # W1 stack (resident)
                    pl.BlockSpec((n_layers, 1, hp), const3),            # b1 stack
                    pl.BlockSpec((n_layers, hp, dp), const3),           # W2 stack
                    pl.BlockSpec((n_layers, 3, dp), const3),            # [b2;gamma;beta] stack
                ],
                out_specs=pl.BlockSpec((tn, dp), lambda i: (i, 0)),
            ),
            compiler_params=pltpu.CompilerParams(
                dimension_semantics=("parallel",),
                vmem_limit_bytes=_VMEM_LIMIT_BYTES,
            ),
        )(*args)

    out = out[:n, :d].reshape(b, s, d)
    # PyTorch's `output.squeeze(1)` drops the seq dim whenever seq == 1 (both for
    # 2-D-unsqueezed inputs and genuine (b, 1, d) inputs); mirror that exactly.
    if s == 1:
        out = out[:, 0, :]
    return out


# ---------------------------------------------------------------------------
# Deterministic params + pure-JAX reference (for a sanity check)
# ---------------------------------------------------------------------------
def init_params(key, embedding_dim, hidden_dim, num_layers):
    """Deterministic per-layer parameters (nn.Linear-style uniform init), f32 masters."""
    layers = []
    for _ in range(num_layers):
        key, k1, k2, k3, k4 = jax.random.split(key, 5)
        lim1 = 1.0 / jnp.sqrt(embedding_dim)
        lim2 = 1.0 / jnp.sqrt(hidden_dim)
        layers.append({
            # stored as (in, out) so the kernel does x @ W (= PyTorch x @ W.T)
            "w1": jax.random.uniform(k1, (embedding_dim, hidden_dim), jnp.float32, -lim1, lim1),
            "b1": jax.random.uniform(k2, (1, hidden_dim), jnp.float32, -lim1, lim1),
            "w2": jax.random.uniform(k3, (hidden_dim, embedding_dim), jnp.float32, -lim2, lim2),
            "b2": jax.random.uniform(k4, (1, embedding_dim), jnp.float32, -lim2, lim2),
            "gamma": jnp.ones((1, embedding_dim), jnp.float32),
            "beta": jnp.zeros((1, embedding_dim), jnp.float32),
        })
    return layers


def _reference_forward(x, layer_params):
    """Pure-JAX reference with the same bf16-weight MXU numerics (f32 elsewhere)."""
    if x.ndim == 2:
        x = x[:, None, :]
    s = x.shape[1]
    for p in layer_params:
        w1 = p["w1"].astype(jnp.bfloat16)
        w2 = p["w2"].astype(jnp.bfloat16)
        h = jnp.maximum(
            jnp.dot(x.astype(jnp.bfloat16), w1, preferred_element_type=jnp.float32) + p["b1"][0],
            0.0)
        ff = jnp.dot(h.astype(jnp.bfloat16), w2, preferred_element_type=jnp.float32) + p["b2"][0]
        y = x + ff
        mu = jnp.mean(y, axis=-1, keepdims=True)
        var = jnp.mean((y - mu) ** 2, axis=-1, keepdims=True)
        x = (y - mu) / jnp.sqrt(var + LN_EPS) * p["gamma"][0] + p["beta"][0]
    return x[:, 0, :] if s == 1 else x


if __name__ == "__main__":
    # Small shapes consistent with OmicsEncoder: (batch, seq, embedding_dim)
    batch, seq, embedding_dim, hidden_dim, num_layers = 2, 8, 32, 64, 2

    key = jax.random.PRNGKey(0)
    key, kx = jax.random.split(key)
    x = jax.random.normal(kx, (batch, seq, embedding_dim), jnp.float32)
    layer_params = init_params(key, embedding_dim, hidden_dim, num_layers)

    prepared = prepare_params(layer_params)                   # stack + lane-pad + bf16 once
    ref = _reference_forward(x, layer_params)

    # Resident-weight (all layers fused) path.
    out = jax.block_until_ready(omics_encoder_forward(x, prepared))
    assert out.shape == (batch, seq, embedding_dim)
    assert jnp.allclose(out, ref, atol=2e-3, rtol=2e-3), "resident path mismatch vs reference"

    # Layer-streaming path (used automatically when the resident stack exceeds VMEM).
    out_s = jax.block_until_ready(omics_encoder_forward(x, prepared, force_streaming=True))
    assert out_s.shape == (batch, seq, embedding_dim)
    assert jnp.allclose(out_s, ref, atol=2e-3, rtol=2e-3), "streaming path mismatch vs reference"

    # 2-D input -> unsqueeze(1) -> ... -> squeeze(1) -> (batch, embedding_dim).
    x2 = x[:, 0, :]
    out2 = jax.block_until_ready(omics_encoder_forward(x2, prepared))
    assert out2.shape == (batch, embedding_dim)
    assert jnp.allclose(out2, _reference_forward(x2, layer_params), atol=2e-3, rtol=2e-3)

    print("KERNEL_OK")
</pallas_src>

<mosaic_0001>
module attributes {stable_mosaic.version = 11 : i64} {
  func.func @_fused_kernel(%arg0: i32, %arg1: memref<16x128xf32, #tpu.memory_space<vmem>>, %arg2: memref<2x128x128xbf16, #tpu.memory_space<vmem>>, %arg3: memref<2x1x128xf32, #tpu.memory_space<vmem>>, %arg4: memref<2x128x128xbf16, #tpu.memory_space<vmem>>, %arg5: memref<2x3x128xf32, #tpu.memory_space<vmem>>, %arg6: memref<16x128xf32, #tpu.memory_space<vmem>>) attributes {dimension_semantics = [#tpu.dimension_semantics<parallel>], iteration_bounds = array<i64: 1>, scalar_prefetch = 0 : i64, scratch_operands = 0 : i64, tpu.core_type = #tpu.core_type<tc>, window_params = [{transform_indices = @transform_0, window_bounds = array<i64: 16, 128>}, {pipeline_mode = #tpu.pipeline_mode<synchronous>, transform_indices = @transform_1, window_bounds = array<i64: 2, 128, 128>}, {pipeline_mode = #tpu.pipeline_mode<synchronous>, transform_indices = @transform_2, window_bounds = array<i64: 2, 1, 128>}, {pipeline_mode = #tpu.pipeline_mode<synchronous>, transform_indices = @transform_3, window_bounds = array<i64: 2, 128, 128>}, {pipeline_mode = #tpu.pipeline_mode<synchronous>, transform_indices = @transform_4, window_bounds = array<i64: 2, 3, 128>}, {transform_indices = @transform_5, window_bounds = array<i64: 16, 128>}]} {
    %c0 = arith.constant 0 : index
    %c0_0 = arith.constant 0 : index
    %0 = vector.load %arg1[%c0, %c0_0] : memref<16x128xf32, #tpu.memory_space<vmem>>, vector<16x128xf32>
    %c0_1 = arith.constant 0 : index
    %c0_2 = arith.constant 0 : index
    %c0_3 = arith.constant 0 : index
    %1 = vector.load %arg5[%c0_1, %c0_2, %c0_3] : memref<2x3x128xf32, #tpu.memory_space<vmem>>, vector<1x3x128xf32>
    %2 = vector.shape_cast %1 : vector<1x3x128xf32> to vector<3x128xf32>
    %c0_4 = arith.constant 0 : index
    %c0_5 = arith.constant 0 : index
    %c0_6 = arith.constant 0 : index
    %3 = vector.load %arg2[%c0_4, %c0_5, %c0_6] : memref<2x128x128xbf16, #tpu.memory_space<vmem>>, vector<1x128x128xbf16>
    %4 = vector.shape_cast %3 : vector<1x128x128xbf16> to vector<128x128xbf16>
    %c0_7 = arith.constant 0 : index
    %c0_8 = arith.constant 0 : index
    %c0_9 = arith.constant 0 : index
    %5 = vector.load %arg3[%c0_7, %c0_8, %c0_9] : memref<2x1x128xf32, #tpu.memory_space<vmem>>, vector<1x1x128xf32>
    %6 = vector.shape_cast %5 : vector<1x1x128xf32> to vector<1x128xf32>
    %c0_10 = arith.constant 0 : index
    %c0_11 = arith.constant 0 : index
    %c0_12 = arith.constant 0 : index
    %7 = vector.load %arg4[%c0_10, %c0_11, %c0_12] : memref<2x128x128xbf16, #tpu.memory_space<vmem>>, vector<1x128x128xbf16>
    %8 = vector.shape_cast %7 : vector<1x128x128xbf16> to vector<128x128xbf16>
    %9 = vector.extract_strided_slice %2 {offsets = [0, 0], sizes = [1, 128], strides = [1, 1]} : vector<3x128xf32> to vector<1x128xf32>
    %10 = vector.extract_strided_slice %2 {offsets = [1, 0], sizes = [1, 128], strides = [1, 1]} : vector<3x128xf32> to vector<1x128xf32>
    %11 = vector.extract_strided_slice %2 {offsets = [2, 0], sizes = [1, 128], strides = [1, 1]} : vector<3x128xf32> to vector<1x128xf32>
    %12 = arith.truncf %0 : vector<16x128xf32> to vector<16x128xbf16>
    %cst = arith.constant dense<0.000000e+00> : vector<16x128xf32>
    %13 = tpu.matmul %12, %4, %cst {dimension_numbers = #tpu.dot_dimension_numbers<[1], [0], [0], [1], [0, 0, 1, 1], [], []>} : vector<16x128xbf16>, vector<128x128xbf16>, vector<16x128xf32> -> vector<16x128xf32>
    %14 = vector.broadcast %6 : vector<1x128xf32> to vector<16x128xf32>
    %15 = arith.addf %13, %14 : vector<16x128xf32>
    %cst_13 = arith.constant 0.000000e+00 : f32
    %16 = vector.broadcast %cst_13 : f32 to vector<16x128xf32>
    %17 = arith.maximumf %15, %16 : vector<16x128xf32>
    %18 = arith.truncf %17 : vector<16x128xf32> to vector<16x128xbf16>
    %cst_14 = arith.constant dense<0.000000e+00> : vector<16x128xf32>
    %19 = tpu.matmul %18, %8, %cst_14 {dimension_numbers = #tpu.dot_dimension_numbers<[1], [0], [0], [1], [0, 0, 1, 1], [], []>} : vector<16x128xbf16>, vector<128x128xbf16>, vector<16x128xf32> -> vector<16x128xf32>
    %20 = vector.broadcast %9 : vector<1x128xf32> to vector<16x128xf32>
    %21 = arith.addf %19, %20 : vector<16x128xf32>
    %22 = arith.addf %0, %21 : vector<16x128xf32>
    %cst_15 = arith.constant dense<0.000000e+00> : vector<16xf32>
    %23 = vector.multi_reduction <add>, %22, %cst_15 [1] : vector<16x128xf32> to vector<16xf32>
    %24 = vector.shape_cast %23 : vector<16xf32> to vector<16x1xf32>
    %cst_16 = arith.constant 3.125000e-02 : f32
    %25 = vector.broadcast %cst_16 : f32 to vector<16x1xf32>
    %26 = arith.mulf %24, %25 : vector<16x1xf32>
    %27 = arith.mulf %22, %22 : vector<16x128xf32>
    %cst_17 = arith.constant dense<0.000000e+00> : vector<16xf32>
    %28 = vector.multi_reduction <add>, %27, %cst_17 [1] : vector<16x128xf32> to vector<16xf32>
    %29 = vector.shape_cast %28 : vector<16xf32> to vector<16x1xf32>
    %cst_18 = arith.constant 3.125000e-02 : f32
    %30 = vector.broadcast %cst_18 : f32 to vector<16x1xf32>
    %31 = arith.mulf %29, %30 : vector<16x1xf32>
    %32 = arith.mulf %26, %26 : vector<16x1xf32>
    %33 = arith.subf %31, %32 : vector<16x1xf32>
    %34 = vector.broadcast %26 : vector<16x1xf32> to vector<16x128xf32>
    %35 = arith.subf %22, %34 : vector<16x128xf32>
    %cst_19 = arith.constant 9.99999974E-6 : f32
    %36 = vector.broadcast %cst_19 : f32 to vector<16x1xf32>
    %37 = arith.addf %33, %36 : vector<16x1xf32>
    %38 = math.rsqrt %37 : vector<16x1xf32>
    %39 = vector.broadcast %38 : vector<16x1xf32> to vector<16x128xf32>
    %40 = arith.mulf %35, %39 : vector<16x128xf32>
    %41 = vector.broadcast %10 : vector<1x128xf32> to vector<16x128xf32>
    %42 = arith.mulf %40, %41 : vector<16x128xf32>
    %43 = vector.broadcast %11 : vector<1x128xf32> to vector<16x128xf32>
    %44 = arith.addf %42, %43 : vector<16x128xf32>
    %c1 = arith.constant 1 : index
    %c0_20 = arith.constant 0 : index
    %c0_21 = arith.constant 0 : index
    %45 = vector.load %arg5[%c1, %c0_20, %c0_21] : memref<2x3x128xf32, #tpu.memory_space<vmem>>, vector<1x3x128xf32>
    %46 = vector.shape_cast %45 : vector<1x3x128xf32> to vector<3x128xf32>
    %c1_22 = arith.constant 1 : index
    %c0_23 = arith.constant 0 : index
    %c0_24 = arith.constant 0 : index
    %47 = vector.load %arg2[%c1_22, %c0_23, %c0_24] : memref<2x128x128xbf16, #tpu.memory_space<vmem>>, vector<1x128x128xbf16>
    %48 = vector.shape_cast %47 : vector<1x128x128xbf16> to vector<128x128xbf16>
    %c1_25 = arith.constant 1 : index
    %c0_26 = arith.constant 0 : index
    %c0_27 = arith.constant 0 : index
    %49 = vector.load %arg3[%c1_25, %c0_26, %c0_27] : memref<2x1x128xf32, #tpu.memory_space<vmem>>, vector<1x1x128xf32>
    %50 = vector.shape_cast %49 : vector<1x1x128xf32> to vector<1x128xf32>
    %c1_28 = arith.constant 1 : index
    %c0_29 = arith.constant 0 : index
    %c0_30 = arith.constant 0 : index
    %51 = vector.load %arg4[%c1_28, %c0_29, %c0_30] : memref<2x128x128xbf16, #tpu.memory_space<vmem>>, vector<1x128x128xbf16>
    %52 = vector.shape_cast %51 : vector<1x128x128xbf16> to vector<128x128xbf16>
    %53 = vector.extract_strided_slice %46 {offsets = [0, 0], sizes = [1, 128], strides = [1, 1]} : vector<3x128xf32> to vector<1x128xf32>
    %54 = vector.extract_strided_slice %46 {offsets = [1, 0], sizes = [1, 128], strides = [1, 1]} : vector<3x128xf32> to vector<1x128xf32>
    %55 = vector.extract_strided_slice %46 {offsets = [2, 0], sizes = [1, 128], strides = [1, 1]} : vector<3x128xf32> to vector<1x128xf32>
    %56 = arith.truncf %44 : vector<16x128xf32> to vector<16x128xbf16>
    %cst_31 = arith.constant dense<0.000000e+00> : vector<16x128xf32>
    %57 = tpu.matmul %56, %48, %cst_31 {dimension_numbers = #tpu.dot_dimension_numbers<[1], [0], [0], [1], [0, 0, 1, 1], [], []>} : vector<16x128xbf16>, vector<128x128xbf16>, vector<16x128xf32> -> vector<16x128xf32>
    %58 = vector.broadcast %50 : vector<1x128xf32> to vector<16x128xf32>
    %59 = arith.addf %57, %58 : vector<16x128xf32>
    %cst_32 = arith.constant 0.000000e+00 : f32
    %60 = vector.broadcast %cst_32 : f32 to vector<16x128xf32>
    %61 = arith.maximumf %59, %60 : vector<16x128xf32>
    %62 = arith.truncf %61 : vector<16x128xf32> to vector<16x128xbf16>
    %cst_33 = arith.constant dense<0.000000e+00> : vector<16x128xf32>
    %63 = tpu.matmul %62, %52, %cst_33 {dimension_numbers = #tpu.dot_dimension_numbers<[1], [0], [0], [1], [0, 0, 1, 1], [], []>} : vector<16x128xbf16>, vector<128x128xbf16>, vector<16x128xf32> -> vector<16x128xf32>
    %64 = vector.broadcast %53 : vector<1x128xf32> to vector<16x128xf32>
    %65 = arith.addf %63, %64 : vector<16x128xf32>
    %66 = arith.addf %44, %65 : vector<16x128xf32>
    %cst_34 = arith.constant dense<0.000000e+00> : vector<16xf32>
    %67 = vector.multi_reduction <add>, %66, %cst_34 [1] : vector<16x128xf32> to vector<16xf32>
    %68 = vector.shape_cast %67 : vector<16xf32> to vector<16x1xf32>
    %cst_35 = arith.constant 3.125000e-02 : f32
    %69 = vector.broadcast %cst_35 : f32 to vector<16x1xf32>
    %70 = arith.mulf %68, %69 : vector<16x1xf32>
    %71 = arith.mulf %66, %66 : vector<16x128xf32>
    %cst_36 = arith.constant dense<0.000000e+00> : vector<16xf32>
    %72 = vector.multi_reduction <add>, %71, %cst_36 [1] : vector<16x128xf32> to vector<16xf32>
    %73 = vector.shape_cast %72 : vector<16xf32> to vector<16x1xf32>
    %cst_37 = arith.constant 3.125000e-02 : f32
    %74 = vector.broadcast %cst_37 : f32 to vector<16x1xf32>
    %75 = arith.mulf %73, %74 : vector<16x1xf32>
    %76 = arith.mulf %70, %70 : vector<16x1xf32>
    %77 = arith.subf %75, %76 : vector<16x1xf32>
    %78 = vector.broadcast %70 : vector<16x1xf32> to vector<16x128xf32>
    %79 = arith.subf %66, %78 : vector<16x128xf32>
    %cst_38 = arith.constant 9.99999974E-6 : f32
    %80 = vector.broadcast %cst_38 : f32 to vector<16x1xf32>
    %81 = arith.addf %77, %80 : vector<16x1xf32>
    %82 = math.rsqrt %81 : vector<16x1xf32>
    %83 = vector.broadcast %82 : vector<16x1xf32> to vector<16x128xf32>
    %84 = arith.mulf %79, %83 : vector<16x128xf32>
    %85 = vector.broadcast %54 : vector<1x128xf32> to vector<16x128xf32>
    %86 = arith.mulf %84, %85 : vector<16x128xf32>
    %87 = vector.broadcast %55 : vector<1x128xf32> to vector<16x128xf32>
    %88 = arith.addf %86, %87 : vector<16x128xf32>
    %c0_39 = arith.constant 0 : index
    %c0_40 = arith.constant 0 : index
    %89 = vector.load %arg6[%c0_39, %c0_40] : memref<16x128xf32, #tpu.memory_space<vmem>>, vector<16x128xf32>
    tpu.vector_store %arg6[%c0_39, %c0_40], %88 {strides = array<i32>} : memref<16x128xf32, #tpu.memory_space<vmem>>, vector<16x128xf32>,
    return
  }
  func.func @transform_0(%arg0: i32) -> (i32, i32) {
    %c0_i32 = arith.constant 0 : i32
    %c0_i32_0 = arith.constant 0 : i32
    return %arg0, %c0_i32 : i32, i32
  }
  func.func @transform_1(%arg0: i32) -> (i32, i32, i32) {
    %c0_i32 = arith.constant 0 : i32
    %c0_i32_0 = arith.constant 0 : i32
    %c0_i32_1 = arith.constant 0 : i32
    %c0_i32_2 = arith.constant 0 : i32
    return %c0_i32, %c0_i32_0, %c0_i32_1 : i32, i32, i32
  }
  func.func @transform_2(%arg0: i32) -> (i32, i32, i32) {
    %c0_i32 = arith.constant 0 : i32
    %c0_i32_0 = arith.constant 0 : i32
    %c0_i32_1 = arith.constant 0 : i32
    %c0_i32_2 = arith.constant 0 : i32
    return %c0_i32, %c0_i32_0, %c0_i32_1 : i32, i32, i32
  }
  func.func @transform_3(%arg0: i32) -> (i32, i32, i32) {
    %c0_i32 = arith.constant 0 : i32
    %c0_i32_0 = arith.constant 0 : i32
    %c0_i32_1 = arith.constant 0 : i32
    %c0_i32_2 = arith.constant 0 : i32
    return %c0_i32, %c0_i32_0, %c0_i32_1 : i32, i32, i32
  }
  func.func @transform_4(%arg0: i32) -> (i32, i32, i32) {
    %c0_i32 = arith.constant 0 : i32
    %c0_i32_0 = arith.constant 0 : i32
    %c0_i32_1 = arith.constant 0 : i32
    %c0_i32_2 = arith.constant 0 : i32
    return %c0_i32, %c0_i32_0, %c0_i32_1 : i32, i32, i32
  }
  func.func @transform_5(%arg0: i32) -> (i32, i32) {
    %c0_i32 = arith.constant 0 : i32
    %c0_i32_0 = arith.constant 0 : i32
    return %arg0, %c0_i32 : i32, i32
  }
}

</mosaic_0001>

<bundles_post_ra>
// kernel: omics_encoder_forward.1
= control target key start
LH: loop header
LB: loop body
LE: loop exit
PB: predicated region body
PF: predicated region fallthrough
CT: control target
= control target key end

     0   :  { %10 = vsyncpa [#allocation3], 0  ;;  %s811_s0 = inlined_call_operand.vmem [shape: f32[16,128], index: 0, kind: input, shape index: {}]   ;;  %s812_s1 = inlined_call_operand.hbm [shape: bf16[2,128,128], index: 1, kind: input, shape index: {}]   ;;  %s813_s2 = inlined_call_operand.vmem [shape: f32[2,1,128], index: 2, kind: input, shape index: {}]   ;;  %s814_s3 = inlined_call_operand.hbm [shape: bf16[2,128,128], index: 3, kind: input, shape index: {}]   ;;  %s815_s4 = inlined_call_operand.vmem [shape: f32[2,3,128], index: 4, kind: input, shape index: {}]   ;;  %s816_s5 = inlined_call_operand.vmem [shape: f32[16,128], index: 5, kind: output, shape index: {}]  }
   0x1   :  { %s18_s20 = sshll.u32 %s812_s1, 4  ;;  %s19_s20 = int_to_ptr.hbm [resolvable:$true] %s18_s20 }
   0x2   :  { %11 = vsyncpa [#allocation5], 0  ;;  %s730_s21 = smov [#allocation2]   ;;  %s33_s25 = sshll.u32 %s814_s3, 4  ;;  %s34_s25 = int_to_ptr.hbm [resolvable:$true] %s33_s25 }
   0x3   :  { %s20_s22 = sshll.u32 %s730_s21, 4  ;;  %s731_s26 = smov 64   ;;  %s21_s22 = int_to_ptr.vmem [resolvable:$true] %s20_s22 }
   0x4   :  { %s732_s27 = smov 4   ;;  %s733_s28 = smov [#allocation4]  }
   0x5   :  { %26 = dma.hbm_to_vmem [thread:$0]  %s19_s20, 2048, %s21_s22, [#allocation3], %s731_s26, %s731_s26, %s732_s27  }
   0x6   :  { %s35_s29 = sshll.u32 %s733_s28, 4  ;;  %s36_s29 = int_to_ptr.vmem [resolvable:$true] %s35_s29 }
   0x7   :  { %41 = dma.hbm_to_vmem [thread:$0]  %s34_s25, 2048, %s36_s29, [#allocation5], %s731_s26, %s731_s26, %s732_s27  }
   0x8   :  { %726 = dma.done.wait [#allocation3], 2048  }
   0x9   :  { %727 = vsyncadd [#allocation3], 4294965248 }
   0xa   :  { %728 = dma.done.wait [#allocation5], 2048  }
   0xb   :  { %729 = vsyncadd [#allocation5], 4294965248  ;;  %v639_v0 = vld [vmem:[#allocation2 + $0x38] sm:$0xff]  ;;  %v638_v1 = vld [vmem:[#allocation2 + $0x30] sm:$0xff] }
   0xc   :  { %140 = vmatpush.bf16.msra.mxu0 %v639_v0  ;;  %v647_v2 = vld [vmem:[#allocation4 + $0x38] sm:$0xff]  ;;  %v646_v3 = vld [vmem:[#allocation4 + $0x30] sm:$0xff]  ;;  %v637_v4 = vld [vmem:[#allocation2 + $0x28] sm:$0xff] }
   0xd   :  { %206 = vmatpush.bf16.msra.mxu1 %v647_v2  ;;  %v645_v5 = vld [vmem:[#allocation4 + $0x28] sm:$0xff]  ;;  %v636_v6 = vld [vmem:[#allocation2 + $0x20] sm:$0xff]  ;;  %v635_v8 = vld [vmem:[#allocation2 + $0x18] sm:$0xff] }
   0xe   :  { %v644_v7 = vld [vmem:[#allocation4 + $0x20] sm:$0xff]  ;;  %v634_v9 = vld [vmem:[#allocation2 + $0x10] sm:$0xff]  ;;  %v633_v10 = vld [vmem:[#allocation2 + $0x8] sm:$0xff] }
   0xf   :  { %v632_v11 = vld [vmem:[#allocation2] sm:$0xff]  ;;  %v53_v13 = vld [vmem:[%s811_s0 + $0x8] sm:$0xff]  ;;  %v643_v15 = vld [vmem:[#allocation4 + $0x18] sm:$0xff] }
  0x10   :  { %141 = vmatpush.bf16.msra.mxu0 %v638_v1  ;;  %v52_v12 = vld [vmem:[%s811_s0] sm:$0xff]  ;;  %v642_v16 = vld [vmem:[#allocation4 + $0x10] sm:$0xff]  ;;  %v641_v17 = vld [vmem:[#allocation4 + $0x8] sm:$0xff] }
  0x11   :  { %207 = vmatpush.bf16.msra.mxu1 %v646_v3  ;;  %v88_v14 = vpack.c.bf16 %v53_v13, %v52_v12  ;;  %v640_v18 = vld [vmem:[#allocation4] sm:$0xff]  ;;  %v655_v37 = vld [vmem:[#allocation2 + $0x78] sm:$0xff]  ;;  %v654_v38 = vld [vmem:[#allocation2 + $0x70] sm:$0xff] }
  0x12   :  { %v668_v20 = vld [vmem:[%s813_s2] ss:$0 sm:$0xff]  ;;  %362 = vmatpush.bf16.msra.mxu2 %v655_v37  ;;  %v653_v39 = vld [vmem:[#allocation2 + $0x68] sm:$0xff]  ;;  %v651_v41 = vld [vmem:[#allocation2 + $0x58] sm:$0xff] }
  0x13   :  { %v782_v27 = vld [vmem:[%s815_s4] sm:$0x7]  ;;  %v650_v42 = vld [vmem:[#allocation2 + $0x50] sm:$0xff]  ;;  %v649_v44 = vld [vmem:[#allocation2 + $0x48] sm:$0xff] }
  0x14   :  { %142 = vmatpush.bf16.msra.mxu0 %v637_v4  ;;  %v157_v28 = vperm.slane %v782_v27, 0  ;;  %v652_v40 = vld [vmem:[#allocation2 + $0x60] sm:$0xff]  ;;  %v663_v57 = vld [vmem:[#allocation4 + $0x78] sm:$0xff]  ;;  %v662_v59 = vld [vmem:[#allocation4 + $0x70] sm:$0xff] }
  0x15   :  { %208 = vmatpush.bf16.msra.mxu1 %v645_v5  ;;  %v648_v49 = vld [vmem:[#allocation2 + $0x40] sm:$0xff]  ;;  %428 = vmatpush.bf16.msra.mxu3 %v663_v57  ;;  %v661_v63 = vld [vmem:[#allocation4 + $0x68] sm:$0xff] }
  0x16   :  { %363 = vmatpush.bf16.msra.mxu2 %v654_v38  ;;  %v660_v2 = vld [vmem:[#allocation4 + $0x60] sm:$0xff] }
  0x18   :  { %143 = vmatpush.bf16.msra.mxu0 %v636_v6 }
  0x19   :  { %209 = vmatpush.bf16.msra.mxu1 %v644_v7  ;;  %429 = vmatpush.bf16.msra.mxu3 %v662_v59 }
  0x1a   :  { %364 = vmatpush.bf16.msra.mxu2 %v653_v39 }
  0x1c   :  { %144 = vmatpush.bf16.msra.mxu0 %v635_v8 }
  0x1d   :  { %210 = vmatpush.bf16.msra.mxu1 %v643_v15  ;;  %430 = vmatpush.bf16.msra.mxu3 %v661_v63 }
  0x1e   :  { %365 = vmatpush.bf16.msra.mxu2 %v652_v40 }
  0x20   :  { %145 = vmatpush.bf16.msra.mxu0 %v634_v9 }
  0x21   :  { %211 = vmatpush.bf16.msra.mxu1 %v642_v16  ;;  %431 = vmatpush.bf16.msra.mxu3 %v660_v2 }
  0x22   :  { %366 = vmatpush.bf16.msra.mxu2 %v651_v41 }
  0x24   :  { %146 = vmatpush.bf16.msra.mxu0 %v633_v10 }
  0x25   :  { %212 = vmatpush.bf16.msra.mxu1 %v641_v17 }
  0x26   :  { %367 = vmatpush.bf16.msra.mxu2 %v650_v42 }
  0x28   :  { %147 = vmatpush.bf16.msra.mxu0 %v632_v11 }
  0x29   :  { %213 = vmatpush.bf16.msra.mxu1 %v640_v18 }
  0x2a   :  { %368 = vmatpush.bf16.msra.mxu2 %v649_v44 }
  0x2b   :  { %148 = vmatmul.bf16.vlgmr.msra.gmra.mxu0 %v88_v14 }
  0x2e   :  { %369 = vmatpush.bf16.msra.mxu2 %v648_v49 }
  0xa8   :  { %v149_v19 = vpop.f32.mrf.mxu0 }
  0xa9   :  { %v150_v21 = vadd.f32 %v668_v20, %v149_v19  ;;  %v269_v19 = vperm.slane %v782_v27, 2 }
  0xab   :  { %v154_v24 = vmax.f32 %v150_v21, 0.0 }
  0xb0   :  { %v151_v22 = vpop.f32.mrf.mxu0 }
  0xb1   :  { %v152_v23 = vadd.f32 %v668_v20, %v151_v22 }
  0xb3   :  { %v155_v25 = vmax.f32 %v152_v23, 0.0 }
  0xb5   :  { %v156_v26 = vpack.c.bf16 %v155_v25, %v154_v24  ;;  %v659_v24 = vld [vmem:[#allocation4 + $0x58] sm:$0xff]  ;;  %v658_v25 = vld [vmem:[#allocation4 + $0x50] sm:$0xff] }
  0xb6   :  { %432 = vmatpush.bf16.msra.mxu3 %v659_v24 }
  0xb7   :  { %214 = vmatmul.bf16.vlgmr.msra.gmra.mxu1 %v156_v26  ;;  %v657_v26 = vld [vmem:[#allocation4 + $0x48] sm:$0xff] }
  0xba   :  { %433 = vmatpush.bf16.msra.mxu3 %v658_v25 }
  0xbe   :  { %434 = vmatpush.bf16.msra.mxu3 %v657_v26 }
 0x134   :  { %v215_v29 = vpop.f32.mrf.mxu1 }
 0x135   :  { %v216_v30 = vadd.f32 %v215_v29, %v157_v28 }
 0x137   :  { %v785_v31 = vadd.f32 %v216_v30, %v52_v12  ;;  %v266_v12 = vperm.slane %v782_v27, 1  ;;  %v669_v30 = vld [vmem:[%s813_s2 + $0x1] ss:$0 sm:$0xff] }
 0x139   :  { %222 = vadd.xlane.f32.xlu0 %v785_v31  ;;  %v228_v32 = vmul.f32 %v785_v31, %v785_v31 }
 0x13b   :  { %230 = vadd.xlane.f32.xlu1 %v228_v32 }
 0x13c   :  { %v217_v33 = vpop.f32.mrf.mxu1 }
 0x13d   :  { %v218_v34 = vadd.f32 %v217_v33, %v157_v28  ;;  %v656_v28 = vld [vmem:[#allocation4 + $0x40] sm:$0xff] }
 0x13e   :  { %435 = vmatpush.bf16.msra.mxu3 %v656_v28 }
 0x13f   :  { %v790_v35 = vadd.f32 %v218_v34, %v53_v13 }
 0x141   :  { %224 = vadd.xlane.f32.xlu0 %v790_v35  ;;  %v229_v36 = vmul.f32 %v790_v35, %v790_v35 }
 0x143   :  { %232 = vadd.xlane.f32.xlu1 %v229_v36  ;;  %v566_v36 = vld [vmem:[%s815_s4 + $0x4] sm:$0x7] }
 0x144   :  { %v379_v37 = vperm.slane %v566_v36, 0 }
 0x1ac   :  { %v223_v43 = vpop.xlane.xlu0 %222 }
 0x1ad   :  { %v226_v45 = vmul.f32 0.03125, %v223_v43 }
 0x1ae   :  { %v231_v46 = vpop.xlane.xlu1 %230 }
 0x1af   :  { %v236_v47 = vmul.f32 %v226_v45, %v226_v45  ;;  %v234_v48 = vmul.f32 0.03125, %v231_v46  ;;  %v240_v10 = vsub.f32 %v785_v31, %v226_v45 }
 0x1b1   :  { %v238_v50 = vsub.f32 %v234_v48, %v236_v47 }
 0x1b3   :  { %v242_v51 = vadd.f32 1e-05, %v238_v50 }
 0x1b4   :  { %v225_v52 = vpop.xlane.xlu0 %224 }
 0x1b5   :  { %670 = vrsqrt.f32 %v242_v51  ;;  %v227_v53 = vmul.f32 0.03125, %v225_v52  ;;  %vm250_vm1 = vweird.f32 %v242_v51 }
 0x1b6   :  { %v233_v54 = vpop.xlane.xlu1 %232 }
 0x1b7   :  { %v237_v55 = vmul.f32 %v227_v53, %v227_v53  ;;  %v235_v56 = vmul.f32 0.03125, %v233_v54  ;;  %v241_v15 = vsub.f32 %v790_v35, %v227_v53 }
 0x1b9   :  { %v239_v58 = vsub.f32 %v235_v56, %v237_v55 }
 0x1bb   :  { %v671_v60 = vpop.eup %670  ;;  %v243_v61 = vadd.f32 1e-05, %v239_v58 }
 0x1bc   :  { %v245_v62 = vmul.f32 %v671_v60, %v242_v51  ;;  %vm251_vm0 = vweird.f32 %v671_v60 }
 0x1bd   :  { %672 = vrsqrt.f32 %v243_v61  ;;  %vm252_vm2 = vmor %vm250_vm1, %vm251_vm0  ;;  %vm260_vm4 = vweird.f32 %v243_v61 }
 0x1be   :  { %v246_v0 = vmul.f32 %v671_v60, %v245_v62 }
 0x1c0   :  { %v247_v1 = vmul.f32 0.5, %v246_v0 }
 0x1c2   :  { %v248_v3 = vsub.f32 1.5, %v247_v1 }
 0x1c3   :  { %v673_v4 = vpop.eup %672 }
 0x1c4   :  { %v249_v5 = vmul.f32 %v671_v60, %v248_v3  ;;  %v255_v6 = vmul.f32 %v673_v4, %v243_v61  ;;  %vm261_vm3 = vweird.f32 %v673_v4 }
 0x1c5   :  { %vm262_vm5 = vmor %vm260_vm4, %vm261_vm3 }
 0x1c6   :  { %v256_v7 = vmul.f32 %v673_v4, %v255_v6  ;;  %v253_v9 = vsel %vm252_vm2, %v671_v60, %v249_v5 }
 0x1c7   :  { %v264_v13 = vmul.f32 %v253_v9, %v240_v10 }
 0x1c8   :  { %v257_v8 = vmul.f32 0.5, %v256_v7 }
 0x1c9   :  { %v267_v18 = vmul.f32 %v266_v12, %v264_v13 }
 0x1ca   :  { %v258_v11 = vsub.f32 1.5, %v257_v8  ;;  %v491_v8 = vperm.slane %v566_v36, 2 }
 0x1cb   :  { %v270_v21 = vadd.f32 %v269_v19, %v267_v18 }
 0x1cc   :  { %v259_v14 = vmul.f32 %v673_v4, %v258_v11 }
 0x1ce   :  { %v263_v16 = vsel %vm262_vm5, %v673_v4, %v259_v14  ;;  %v488_v4 = vperm.slane %v566_v36, 1 }
 0x1cf   :  { %v265_v17 = vmul.f32 %v263_v16, %v241_v15 }
 0x1d1   :  { %v268_v20 = vmul.f32 %v266_v12, %v265_v17 }
 0x1d3   :  { %v271_v22 = vadd.f32 %v269_v19, %v268_v20 }
 0x1d5   :  { %v310_v23 = vpack.c.bf16 %v271_v22, %v270_v21 }
 0x1d7   :  { %370 = vmatmul.bf16.vlgmr.msra.gmra.mxu2 %v310_v23 }
 0x25a   :  { %v371_v29 = vpop.f32.mrf.mxu2 }
 0x25b   :  { %v372_v31 = vadd.f32 %v669_v30, %v371_v29 }
 0x25d   :  { %v376_v33 = vmax.f32 %v372_v31, 0.0 }
 0x262   :  { %v373_v27 = vpop.f32.mrf.mxu2 }
 0x263   :  { %v374_v32 = vadd.f32 %v669_v30, %v373_v27 }
 0x265   :  { %v377_v34 = vmax.f32 %v374_v32, 0.0 }
 0x267   :  { %v378_v35 = vpack.c.bf16 %v377_v34, %v376_v33 }
 0x269   :  { %436 = vmatmul.bf16.vlgmr.msra.gmra.mxu3 %v378_v35 }
 0x2ec   :  { %v437_v38 = vpop.f32.mrf.mxu3 }
 0x2ed   :  { %v438_v39 = vadd.f32 %v437_v38, %v379_v37 }
 0x2ef   :  { %v442_v40 = vadd.f32 %v438_v39, %v270_v21 }
 0x2f1   :  { %444 = vadd.xlane.f32.xlu2 %v442_v40  ;;  %v450_v41 = vmul.f32 %v442_v40, %v442_v40 }
 0x2f3   :  { %452 = vadd.xlane.f32.xlu0 %v450_v41 }
 0x2f4   :  { %v439_v42 = vpop.f32.mrf.mxu3 }
 0x2f5   :  { %v440_v43 = vadd.f32 %v439_v42, %v379_v37 }
 0x2f7   :  { %v443_v44 = vadd.f32 %v440_v43, %v271_v22 }
 0x2f9   :  { %446 = vadd.xlane.f32.xlu2 %v443_v44  ;;  %v451_v45 = vmul.f32 %v443_v44, %v443_v44 }
 0x2fb   :  { %454 = vadd.xlane.f32.xlu1 %v451_v45 }
 0x364   :  { %v445_v46 = vpop.xlane.xlu2 %444 }
 0x365   :  { %v448_v47 = vmul.f32 0.03125, %v445_v46 }
 0x366   :  { %v453_v48 = vpop.xlane.xlu0 %452 }
 0x367   :  { %v458_v49 = vmul.f32 %v448_v47, %v448_v47  ;;  %v456_v50 = vmul.f32 0.03125, %v453_v48  ;;  %v462_v5 = vsub.f32 %v442_v40, %v448_v47 }
 0x369   :  { %v460_v51 = vsub.f32 %v456_v50, %v458_v49 }
 0x36b   :  { %v464_v52 = vadd.f32 1e-05, %v460_v51 }
 0x36c   :  { %v447_v53 = vpop.xlane.xlu2 %446 }
 0x36d   :  { %674 = vrsqrt.f32 %v464_v52  ;;  %v449_v54 = vmul.f32 0.03125, %v447_v53  ;;  %vm472_vm7 = vweird.f32 %v464_v52 }
 0x36e   :  { %v455_v55 = vpop.xlane.xlu1 %454 }
 0x36f   :  { %v459_v56 = vmul.f32 %v449_v54, %v449_v54  ;;  %v457_v57 = vmul.f32 0.03125, %v455_v55  ;;  %v463_v15 = vsub.f32 %v443_v44, %v449_v54 }
 0x371   :  { %v461_v58 = vsub.f32 %v457_v57, %v459_v56 }
 0x373   :  { %v675_v59 = vpop.eup %674  ;;  %v465_v60 = vadd.f32 1e-05, %v461_v58 }
 0x374   :  { %v467_v61 = vmul.f32 %v675_v59, %v464_v52  ;;  %vm473_vm6 = vweird.f32 %v675_v59 }
 0x375   :  { %676 = vrsqrt.f32 %v465_v60  ;;  %vm474_vm8 = vmor %vm472_vm7, %vm473_vm6  ;;  %vm482_vm10 = vweird.f32 %v465_v60 }
 0x376   :  { %v468_v62 = vmul.f32 %v675_v59, %v467_v61 }
 0x378   :  { %v469_v63 = vmul.f32 0.5, %v468_v62 }
 0x37a   :  { %v470_v0 = vsub.f32 1.5, %v469_v63 }
 0x37b   :  { %v677_v1 = vpop.eup %676 }
 0x37c   :  { %v471_v2 = vmul.f32 %v675_v59, %v470_v0  ;;  %v477_v3 = vmul.f32 %v677_v1, %v465_v60  ;;  %vm483_vm9 = vweird.f32 %v677_v1 }
 0x37d   :  { %vm484_vm11 = vmor %vm482_vm10, %vm483_vm9 }
 0x37e   :  { %v475_v6 = vsel %vm474_vm8, %v675_v59, %v471_v2  ;;  %v478_v7 = vmul.f32 %v677_v1, %v477_v3 }
 0x37f   :  { %v486_v9 = vmul.f32 %v475_v6, %v462_v5 }
 0x380   :  { %v479_v10 = vmul.f32 0.5, %v478_v7 }
 0x381   :  { %v489_v11 = vmul.f32 %v488_v4, %v486_v9 }
 0x382   :  { %v480_v12 = vsub.f32 1.5, %v479_v10 }
 0x383   :  { %v492_v13 = vadd.f32 %v491_v8, %v489_v11 }
 0x384   :  { %v481_v14 = vmul.f32 %v677_v1, %v480_v12 }
 0x385   :  { %494 = vst [vmem:[%s816_s5] sm:$0xff] %v492_v13 }
 0x386   :  { %v485_v16 = vsel %vm484_vm11, %v677_v1, %v481_v14 }
 0x387   :  { %v487_v17 = vmul.f32 %v485_v16, %v463_v15 }
 0x389   :  { %v490_v18 = vmul.f32 %v488_v4, %v487_v17 }
 0x38b   :  { %v493_v19 = vadd.f32 %v491_v8, %v490_v18 }
 0x38d   :  { %495 = vst [vmem:[%s816_s5 + $0x8] sm:$0xff] %v493_v19 }
 0x38e   :  { %500 = vsyncpa [#allocation3], 1 }
 0x38f   :  { %501 = vsyncpa [#allocation5], 1 }

</bundles_post_ra>
